<compile_context>
chip_gen: v5e
topology: v5e:2x2
jax: 0.10.0
libtpu: 0.0.40
codegen_flags: <defaults>
</compile_context>

<pallas_src>
import functools

import jax
import jax.numpy as jnp
import numpy as np
from jax.experimental import pallas as pl
from jax.experimental.pallas import tpu as pltpu


def _round_up(x, m):
    return ((x + m - 1) // m) * m


# ----------------------------------------------------------------------------
# Kernel 1: CovariateModel — Gaussian (mean, var) through Linear(K, p).
# Block shapes: pmx/plvx (TM, K), wt/w2t (K, P_pad), b (1, P_pad),
#               outputs (TM, P_pad) lane-dense.
# ----------------------------------------------------------------------------
def covariate_kernel(pmx_ref, plvx_ref, wt_ref, w2t_ref, b_ref,
                     mean_ref, var_ref):
    pmx = pmx_ref[...]                      # (TM, K)
    pvx = jnp.exp(plvx_ref[...])            # (TM, K)  EUP
    wt = wt_ref[...]                        # (K, P_pad)
    w2t = w2t_ref[...]                      # (K, P_pad)
    K = pmx.shape[1]

    # K is tiny (latent dim ~4): a VPU broadcast-FMA chain beats waking the MXU.
    mean = pmx[:, 0:1] * wt[0:1, :] + b_ref[...]
    var = pvx[:, 0:1] * w2t[0:1, :]
    for k in range(1, K):                   # static unroll over K
        mean = mean + pmx[:, k:k + 1] * wt[k:k + 1, :]
        var = var + pvx[:, k:k + 1] * w2t[k:k + 1, :]

    mean_ref[...] = mean
    var_ref[...] = var


# ----------------------------------------------------------------------------
# Kernel 2: AdjacencyModel — edges live on the lane axis (lane-dense).
#   pos_ref : (4K, TE)  rows = [pm0 ; plog_var0 ; pm1 ; plog_var1]
#   het_ref : (4,  TE)  rows = [hm0 ; hlog_var0 ; hm1 ; hlog_var1]
#   out_ref : (2,  TE)  rows = [mean_adj ; var_adj]
# ----------------------------------------------------------------------------
def adjacency_kernel(pos_ref, het_ref, out_ref):
    pos = pos_ref[...]                      # (4K, TE)
    K = pos.shape[0] // 4
    pm0 = pos[0 * K:1 * K]
    pv0 = jnp.exp(pos[1 * K:2 * K])
    pm1 = pos[2 * K:3 * K]
    pv1 = jnp.exp(pos[3 * K:4 * K])

    het = het_ref[...]                      # (4, TE)
    hm0 = het[0:1]
    hv0 = jnp.exp(het[1:2])
    hm1 = het[2:3]
    hv1 = jnp.exp(het[3:4])

    ip_mean = jnp.sum(pm0 * pm1, axis=0, keepdims=True)                 # (1, TE)
    # factored: pv1*(pm0^2 + pv0) + pv0*pm1^2  == pm0^2 pv1 + pm1^2 pv0 + pv0 pv1
    ip_var = jnp.sum(pv1 * (pm0 * pm0 + pv0) + pv0 * (pm1 * pm1),
                     axis=0, keepdims=True)                             # (1, TE)

    out_ref[...] = jnp.concatenate(
        [hm0 + hm1 + ip_mean, hv0 + hv1 + ip_var], axis=0)              # (2, TE)


# ----------------------------------------------------------------------------
# Parameter container (deterministic init) + forward wrapper.
# ----------------------------------------------------------------------------
def init_params(key, K, N, p_cts, p_bin):
    p = p_cts + p_bin
    k1, k2, k3, k4, k5, k6 = jax.random.split(key, 6)
    return {
        # Encoder variational parameters (ADVI lookup tables).
        "pos_mean": jax.random.normal(k1, (N, K), jnp.float32),
        "pos_logvar": 0.1 * jax.random.normal(k2, (N, K), jnp.float32) - 1.0,
        "het_mean": jax.random.normal(k3, (N, 1), jnp.float32),
        "het_logvar": 0.1 * jax.random.normal(k4, (N, 1), jnp.float32) - 1.0,
        # CovariateModel mean model: nn.Linear(K, p) -> weight (p, K), bias (p,).
        "W": jax.random.normal(k5, (p, K), jnp.float32) / jnp.sqrt(K),
        "b": 0.1 * jax.random.normal(k6, (p,), jnp.float32),
    }


def joint_model_forward(params, i0, i1, iX, p_cts, p_bin,
                        *, max_row_tile=1024, max_lane_tile=2048):
    """Forward pass of JointModel:
    returns (mean_cts, var_cts, mean_bin, var_bin, mean_adj, var_adj)."""
    f32 = jnp.float32
    K = params["pos_mean"].shape[1]
    p = p_cts + p_bin

    # ---------------- encode: embedding gathers (glue, plain JAX) -----------
    pm0 = params["pos_mean"][i0]
    plv0 = params["pos_logvar"][i0]
    hm0 = params["het_mean"][i0]
    hlv0 = params["het_logvar"][i0]
    pm1 = params["pos_mean"][i1]
    plv1 = params["pos_logvar"][i1]
    hm1 = params["het_mean"][i1]
    hlv1 = params["het_logvar"][i1]
    pmx = params["pos_mean"][iX]
    plvx = params["pos_logvar"][iX]

    E = pm0.shape[0]
    M = pmx.shape[0]

    # ================ covariate path: row-tiled over M ======================
    P_pad = max(128, _round_up(p, 128))          # lane-dense output width
    TM = min(max_row_tile, _round_up(M, 8))      # sublane-aligned row tile
    M_pad = _round_up(M, TM)

    w = params["W"].astype(f32)                                   # (p, K)
    wt = jnp.pad(w.T, ((0, 0), (0, P_pad - p)))                   # (K, P_pad)
    w2t = jnp.pad((w * w).T, ((0, 0), (0, P_pad - p)))            # (K, P_pad)
    b = jnp.pad(params["b"].astype(f32), (0, P_pad - p)).reshape(1, P_pad)

    pmx_p = jnp.pad(pmx.astype(f32), ((0, M_pad - M), (0, 0)))
    plvx_p = jnp.pad(plvx.astype(f32), ((0, M_pad - M), (0, 0)))

    cov_cost = pl.CostEstimate(
        flops=4 * M_pad * K * P_pad,
        transcendentals=M_pad * K,
        bytes_accessed=4 * (2 * M_pad * K + 2 * K * P_pad + P_pad
                            + 2 * M_pad * P_pad),
    )
    mean_cov, var_cov = pl.pallas_call(
        covariate_kernel,
        out_shape=(jax.ShapeDtypeStruct((M_pad, P_pad), f32),
                   jax.ShapeDtypeStruct((M_pad, P_pad), f32)),
        grid=(M_pad // TM,),
        in_specs=[
            pl.BlockSpec((TM, K), lambda i: (i, 0)),       # pmx
            pl.BlockSpec((TM, K), lambda i: (i, 0)),       # plvx
            pl.BlockSpec((K, P_pad), lambda i: (0, 0)),    # W.T   (resident)
            pl.BlockSpec((K, P_pad), lambda i: (0, 0)),    # (W*W).T
            pl.BlockSpec((1, P_pad), lambda i: (0, 0)),    # bias
        ],
        out_specs=(
            pl.BlockSpec((TM, P_pad), lambda i: (i, 0)),
            pl.BlockSpec((TM, P_pad), lambda i: (i, 0)),
        ),
        compiler_params=pltpu.CompilerParams(
            dimension_semantics=("parallel",),
            vmem_limit_bytes=32 * 1024 * 1024,
        ),
        cost_estimate=cov_cost,
    )(pmx_p, plvx_p, wt, w2t, b)

    mean_cts = mean_cov[:M, :p_cts]
    var_cts = var_cov[:M, :p_cts]
    mean_bin = mean_cov[:M, p_cts:p]
    var_bin = var_cov[:M, p_cts:p]

    # ================ adjacency path: lane-tiled over E ======================
    TE = min(max_lane_tile, _round_up(E, 128))   # lane tile, multiple of 128
    E_pad = _round_up(E, TE)

    # Pack / transpose so E is the lane axis; one dense DMA per stream (glue).
    pos_packed = jnp.concatenate([pm0, plv0, pm1, plv1], axis=1).T   # (4K, E)
    het_packed = jnp.concatenate([hm0, hlv0, hm1, hlv1], axis=1).T   # (4, E)
    pos_packed = jnp.pad(pos_packed.astype(f32), ((0, 0), (0, E_pad - E)))
    het_packed = jnp.pad(het_packed.astype(f32), ((0, 0), (0, E_pad - E)))

    adj_cost = pl.CostEstimate(
        flops=10 * E_pad * K + 6 * E_pad,
        transcendentals=E_pad * (2 * K + 2),
        bytes_accessed=4 * (E_pad * (4 * K + 4) + 2 * E_pad),
    )
    adj_out = pl.pallas_call(
        adjacency_kernel,
        out_shape=jax.ShapeDtypeStruct((2, E_pad), f32),
        grid=(E_pad // TE,),
        in_specs=[
            pl.BlockSpec((4 * K, TE), lambda i: (0, i)),   # packed positions
            pl.BlockSpec((4, TE), lambda i: (0, i)),       # packed heterogeneities
        ],
        out_specs=pl.BlockSpec((2, TE), lambda i: (0, i)),
        compiler_params=pltpu.CompilerParams(
            dimension_semantics=("parallel",),
            vmem_limit_bytes=32 * 1024 * 1024,
        ),
        cost_estimate=adj_cost,
    )(pos_packed, het_packed)

    mean_adj = adj_out[0, :E].reshape(E, 1)
    var_adj = adj_out[1, :E].reshape(E, 1)

    return mean_cts, var_cts, mean_bin, var_bin, mean_adj, var_adj


# ----------------------------------------------------------------------------
# Plain-JAX reference (correctness check).
# ----------------------------------------------------------------------------
def joint_model_reference(params, i0, i1, iX, p_cts, p_bin):
    pm0 = params["pos_mean"][i0]
    pv0 = jnp.exp(params["pos_logvar"][i0])
    hm0 = params["het_mean"][i0]
    hv0 = jnp.exp(params["het_logvar"][i0])
    pm1 = params["pos_mean"][i1]
    pv1 = jnp.exp(params["pos_logvar"][i1])
    hm1 = params["het_mean"][i1]
    hv1 = jnp.exp(params["het_logvar"][i1])
    pmx = params["pos_mean"][iX]
    pvx = jnp.exp(params["pos_logvar"][iX])

    w = params["W"]
    b = params["b"]
    mean_cov = pmx @ w.T + b
    var_cov = pvx @ (w * w).T
    mean_adj = hm0 + hm1 + jnp.sum(pm0 * pm1, axis=-1, keepdims=True)
    var_adj = hv0 + hv1 + jnp.sum(
        pm0 ** 2 * pv1 + pm1 ** 2 * pv0 + pv0 * pv1, axis=-1, keepdims=True)
    return (mean_cov[:, :p_cts], var_cov[:, :p_cts],
            mean_cov[:, p_cts:], var_cov[:, p_cts:],
            mean_adj, var_adj)


if __name__ == "__main__":
    # Small, deterministic shapes consistent with the module:
    #   N = 32 nodes, K = 4 latent dims, p_cts = 3, p_bin = 2,
    #   E = 20 edge pairs (i0, i1), M = 12 covariate rows (iX).
    K, N, p_cts, p_bin = 4, 32, 3, 2
    E, M = 20, 12

    key = jax.random.PRNGKey(0)
    kp, k0, k1, kx = jax.random.split(key, 4)
    params = init_params(kp, K, N, p_cts, p_bin)
    i0 = jax.random.randint(k0, (E,), 0, N, dtype=jnp.int32)
    i1 = jax.random.randint(k1, (E,), 0, N, dtype=jnp.int32)
    iX = jax.random.randint(kx, (M,), 0, N, dtype=jnp.int32)

    outs = joint_model_forward(params, i0, i1, iX, p_cts, p_bin)
    outs = jax.block_until_ready(outs)

    refs = joint_model_reference(params, i0, i1, iX, p_cts, p_bin)
    for o, r in zip(outs, refs):
        np.testing.assert_allclose(np.asarray(o), np.asarray(r),
                                   rtol=1e-5, atol=1e-5)

    print("KERNEL_OK")
</pallas_src>

<mosaic_0001>
module attributes {stable_mosaic.version = 11 : i64} {
  func.func @covariate_kernel(%arg0: i32, %arg1: memref<16x4xf32, #tpu.memory_space<vmem>>, %arg2: memref<16x4xf32, #tpu.memory_space<vmem>>, %arg3: memref<4x128xf32, #tpu.memory_space<vmem>>, %arg4: memref<4x128xf32, #tpu.memory_space<vmem>>, %arg5: memref<1x128xf32, #tpu.memory_space<vmem>>, %arg6: memref<16x128xf32, #tpu.memory_space<vmem>>, %arg7: memref<16x128xf32, #tpu.memory_space<vmem>>) attributes {dimension_semantics = [#tpu.dimension_semantics<parallel>], iteration_bounds = array<i64: 1>, scalar_prefetch = 0 : i64, scratch_operands = 0 : i64, tpu.core_type = #tpu.core_type<tc>, window_params = [{transform_indices = @transform_0, window_bounds = array<i64: 16, 4>}, {transform_indices = @transform_1, window_bounds = array<i64: 16, 4>}, {pipeline_mode = #tpu.pipeline_mode<synchronous>, transform_indices = @transform_2, window_bounds = array<i64: 4, 128>}, {pipeline_mode = #tpu.pipeline_mode<synchronous>, transform_indices = @transform_3, window_bounds = array<i64: 4, 128>}, {pipeline_mode = #tpu.pipeline_mode<synchronous>, transform_indices = @transform_4, window_bounds = array<i64: 1, 128>}, {transform_indices = @transform_5, window_bounds = array<i64: 16, 128>}, {transform_indices = @transform_6, window_bounds = array<i64: 16, 128>}]} {
    %c0 = arith.constant 0 : index
    %c0_0 = arith.constant 0 : index
    %0 = vector.load %arg1[%c0, %c0_0] : memref<16x4xf32, #tpu.memory_space<vmem>>, vector<16x4xf32>
    %c0_1 = arith.constant 0 : index
    %c0_2 = arith.constant 0 : index
    %1 = vector.load %arg2[%c0_1, %c0_2] : memref<16x4xf32, #tpu.memory_space<vmem>>, vector<16x4xf32>
    %2 = math.exp %1 : vector<16x4xf32>
    %c0_3 = arith.constant 0 : index
    %c0_4 = arith.constant 0 : index
    %3 = vector.load %arg3[%c0_3, %c0_4] : memref<4x128xf32, #tpu.memory_space<vmem>>, vector<4x128xf32>
    %c0_5 = arith.constant 0 : index
    %c0_6 = arith.constant 0 : index
    %4 = vector.load %arg4[%c0_5, %c0_6] : memref<4x128xf32, #tpu.memory_space<vmem>>, vector<4x128xf32>
    %5 = vector.extract_strided_slice %0 {offsets = [0, 0], sizes = [16, 1], strides = [1, 1]} : vector<16x4xf32> to vector<16x1xf32>
    %6 = vector.extract_strided_slice %3 {offsets = [0, 0], sizes = [1, 128], strides = [1, 1]} : vector<4x128xf32> to vector<1x128xf32>
    %7 = vector.broadcast %5 : vector<16x1xf32> to vector<16x128xf32>
    %8 = vector.broadcast %6 : vector<1x128xf32> to vector<16x128xf32>
    %9 = arith.mulf %7, %8 : vector<16x128xf32>
    %c0_7 = arith.constant 0 : index
    %c0_8 = arith.constant 0 : index
    %10 = vector.load %arg5[%c0_7, %c0_8] : memref<1x128xf32, #tpu.memory_space<vmem>>, vector<1x128xf32>
    %11 = vector.broadcast %10 : vector<1x128xf32> to vector<16x128xf32>
    %12 = arith.addf %9, %11 : vector<16x128xf32>
    %13 = vector.extract_strided_slice %2 {offsets = [0, 0], sizes = [16, 1], strides = [1, 1]} : vector<16x4xf32> to vector<16x1xf32>
    %14 = vector.extract_strided_slice %4 {offsets = [0, 0], sizes = [1, 128], strides = [1, 1]} : vector<4x128xf32> to vector<1x128xf32>
    %15 = vector.broadcast %13 : vector<16x1xf32> to vector<16x128xf32>
    %16 = vector.broadcast %14 : vector<1x128xf32> to vector<16x128xf32>
    %17 = arith.mulf %15, %16 : vector<16x128xf32>
    %18 = vector.extract_strided_slice %0 {offsets = [0, 1], sizes = [16, 1], strides = [1, 1]} : vector<16x4xf32> to vector<16x1xf32>
    %19 = vector.extract_strided_slice %3 {offsets = [1, 0], sizes = [1, 128], strides = [1, 1]} : vector<4x128xf32> to vector<1x128xf32>
    %20 = vector.broadcast %18 : vector<16x1xf32> to vector<16x128xf32>
    %21 = vector.broadcast %19 : vector<1x128xf32> to vector<16x128xf32>
    %22 = arith.mulf %20, %21 : vector<16x128xf32>
    %23 = arith.addf %12, %22 : vector<16x128xf32>
    %24 = vector.extract_strided_slice %2 {offsets = [0, 1], sizes = [16, 1], strides = [1, 1]} : vector<16x4xf32> to vector<16x1xf32>
    %25 = vector.extract_strided_slice %4 {offsets = [1, 0], sizes = [1, 128], strides = [1, 1]} : vector<4x128xf32> to vector<1x128xf32>
    %26 = vector.broadcast %24 : vector<16x1xf32> to vector<16x128xf32>
    %27 = vector.broadcast %25 : vector<1x128xf32> to vector<16x128xf32>
    %28 = arith.mulf %26, %27 : vector<16x128xf32>
    %29 = arith.addf %17, %28 : vector<16x128xf32>
    %30 = vector.extract_strided_slice %0 {offsets = [0, 2], sizes = [16, 1], strides = [1, 1]} : vector<16x4xf32> to vector<16x1xf32>
    %31 = vector.extract_strided_slice %3 {offsets = [2, 0], sizes = [1, 128], strides = [1, 1]} : vector<4x128xf32> to vector<1x128xf32>
    %32 = vector.broadcast %30 : vector<16x1xf32> to vector<16x128xf32>
    %33 = vector.broadcast %31 : vector<1x128xf32> to vector<16x128xf32>
    %34 = arith.mulf %32, %33 : vector<16x128xf32>
    %35 = arith.addf %23, %34 : vector<16x128xf32>
    %36 = vector.extract_strided_slice %2 {offsets = [0, 2], sizes = [16, 1], strides = [1, 1]} : vector<16x4xf32> to vector<16x1xf32>
    %37 = vector.extract_strided_slice %4 {offsets = [2, 0], sizes = [1, 128], strides = [1, 1]} : vector<4x128xf32> to vector<1x128xf32>
    %38 = vector.broadcast %36 : vector<16x1xf32> to vector<16x128xf32>
    %39 = vector.broadcast %37 : vector<1x128xf32> to vector<16x128xf32>
    %40 = arith.mulf %38, %39 : vector<16x128xf32>
    %41 = arith.addf %29, %40 : vector<16x128xf32>
    %42 = vector.extract_strided_slice %0 {offsets = [0, 3], sizes = [16, 1], strides = [1, 1]} : vector<16x4xf32> to vector<16x1xf32>
    %43 = vector.extract_strided_slice %3 {offsets = [3, 0], sizes = [1, 128], strides = [1, 1]} : vector<4x128xf32> to vector<1x128xf32>
    %44 = vector.broadcast %42 : vector<16x1xf32> to vector<16x128xf32>
    %45 = vector.broadcast %43 : vector<1x128xf32> to vector<16x128xf32>
    %46 = arith.mulf %44, %45 : vector<16x128xf32>
    %47 = arith.addf %35, %46 : vector<16x128xf32>
    %48 = vector.extract_strided_slice %2 {offsets = [0, 3], sizes = [16, 1], strides = [1, 1]} : vector<16x4xf32> to vector<16x1xf32>
    %49 = vector.extract_strided_slice %4 {offsets = [3, 0], sizes = [1, 128], strides = [1, 1]} : vector<4x128xf32> to vector<1x128xf32>
    %50 = vector.broadcast %48 : vector<16x1xf32> to vector<16x128xf32>
    %51 = vector.broadcast %49 : vector<1x128xf32> to vector<16x128xf32>
    %52 = arith.mulf %50, %51 : vector<16x128xf32>
    %53 = arith.addf %41, %52 : vector<16x128xf32>
    %c0_9 = arith.constant 0 : index
    %c0_10 = arith.constant 0 : index
    %54 = vector.load %arg6[%c0_9, %c0_10] : memref<16x128xf32, #tpu.memory_space<vmem>>, vector<16x128xf32>
    tpu.vector_store %arg6[%c0_9, %c0_10], %47 {strides = array<i32>} : memref<16x128xf32, #tpu.memory_space<vmem>>, vector<16x128xf32>,
    %c0_11 = arith.constant 0 : index
    %c0_12 = arith.constant 0 : index
    %55 = vector.load %arg7[%c0_11, %c0_12] : memref<16x128xf32, #tpu.memory_space<vmem>>, vector<16x128xf32>
    tpu.vector_store %arg7[%c0_11, %c0_12], %53 {strides = array<i32>} : memref<16x128xf32, #tpu.memory_space<vmem>>, vector<16x128xf32>,
    return
  }
  func.func @transform_0(%arg0: i32) -> (i32, i32) {
    %c0_i32 = arith.constant 0 : i32
    %c0_i32_0 = arith.constant 0 : i32
    return %arg0, %c0_i32 : i32, i32
  }
  func.func @transform_1(%arg0: i32) -> (i32, i32) {
    %c0_i32 = arith.constant 0 : i32
    %c0_i32_0 = arith.constant 0 : i32
    return %arg0, %c0_i32 : i32, i32
  }
  func.func @transform_2(%arg0: i32) -> (i32, i32) {
    %c0_i32 = arith.constant 0 : i32
    %c0_i32_0 = arith.constant 0 : i32
    %c0_i32_1 = arith.constant 0 : i32
    return %c0_i32, %c0_i32_0 : i32, i32
  }
  func.func @transform_3(%arg0: i32) -> (i32, i32) {
    %c0_i32 = arith.constant 0 : i32
    %c0_i32_0 = arith.constant 0 : i32
    %c0_i32_1 = arith.constant 0 : i32
    return %c0_i32, %c0_i32_0 : i32, i32
  }
  func.func @transform_4(%arg0: i32) -> (i32, i32) {
    %c0_i32 = arith.constant 0 : i32
    %c0_i32_0 = arith.constant 0 : i32
    %c0_i32_1 = arith.constant 0 : i32
    return %c0_i32, %c0_i32_0 : i32, i32
  }
  func.func @transform_5(%arg0: i32) -> (i32, i32) {
    %c0_i32 = arith.constant 0 : i32
    %c0_i32_0 = arith.constant 0 : i32
    return %arg0, %c0_i32 : i32, i32
  }
  func.func @transform_6(%arg0: i32) -> (i32, i32) {
    %c0_i32 = arith.constant 0 : i32
    %c0_i32_0 = arith.constant 0 : i32
    return %arg0, %c0_i32 : i32, i32
  }
}

</mosaic_0001>

<bundles_post_ra>
// kernel: tpu_custom_call.1
= control target key start
LH: loop header
LB: loop body
LE: loop exit
PB: predicated region body
PF: predicated region fallthrough
CT: control target
= control target key end

     0   :  { %12 = vsyncpa [#allocation3], 0  ;;  %v260_v2 = vmov 0   ;;  %v261_v4 = vmov 1   ;;  %s330_s0 = inlined_call_operand.vmem [shape: f32[16,4], index: 0, kind: input, shape index: {}]   ;;  %s331_s1 = inlined_call_operand.vmem [shape: f32[16,4], index: 1, kind: input, shape index: {}]   ;;  %s332_s2 = inlined_call_operand.vmem [shape: f32[4,128], index: 2, kind: input, shape index: {}]   ;;  %s333_s3 = inlined_call_operand.vmem [shape: f32[4,128], index: 3, kind: input, shape index: {}]   ;;  %s334_s4 = inlined_call_operand.vmem [shape: f32[1,128], index: 4, kind: input, shape index: {}]   ;;  %s335_s5 = inlined_call_operand.hbm [shape: f32[16,128], index: 5, kind: output, shape index: {0}]   ;;  %s336_s6 = inlined_call_operand.hbm [shape: f32[16,128], index: 6, kind: output, shape index: {1}]  }
   0x1   :  { %v24_v0 = vld [vmem:[%s330_s0] sm:$0xff]  ;;  %192 = vset.pattern.permute.xlu0 %v260_v2  ;;  %194 = vset.pattern.permute.xlu1 %v260_v2  ;;  %v27_v5 = vld [vmem:[%s331_s1 + $0x8] sm:$0xff] }
   0x2   :  { %v26_v1 = vld [vmem:[%s331_s1] sm:$0xff]  ;;  %36 = vperm.xlu0 %192, %v24_v0   ;;  %193 = vset.pattern.permute.xlu2 %v261_v4 }
   0x3   :  { %v28_v3 = vmul.f32 1.442695, %v26_v1 }
   0x4   :  { %13 = vsyncpa [#allocation5], 0  ;;  %67 = vperm.xlu2 %193, %v24_v0   ;;  %v30_v6 = vmul.f32 1.442695, %v27_v5  ;;  %v25_v7 = vld [vmem:[%s330_s0 + $0x8] sm:$0xff]  ;;  %v262_v10 = vmov 2  }
   0x5   :  { %204 = vpow2.f32 %v28_v3  ;;  %v263_v11 = vmov 3   ;;  %v32_v22 = vld [vmem:[%s332_s2] sm:$0xf]  ;;  %s264_s2 = smov [#allocation2]   ;;  %s154_s10 = sshll.u32 %s335_s5, 4  ;;  %s155_s10 = int_to_ptr.hbm [resolvable:$true] %s154_s10 }
   0x6   :  { %206 = vpow2.f32 %v30_v6  ;;  %v33_v23 = vld [vmem:[%s333_s3] sm:$0xf]  ;;  %v44_v24 = vperm.slane %v32_v22, 0  ;;  %v74_v34 = vperm.slane %v32_v22, 1  ;;  %v126_v43 = vperm.slane %v32_v22, 3  ;;  %s152_s3 = sshll.u32 %s264_s2, 4  ;;  %s153_s3 = int_to_ptr.vmem [resolvable:$true] %s152_s3 }
   0x7   :  { %v63_v25 = vperm.slane %v33_v23, 0  ;;  %v87_v26 = vperm.slane %v33_v23, 1  ;;  %v139_v27 = vperm.slane %v33_v23, 3  ;;  %v113_v28 = vperm.slane %v33_v23, 2  ;;  %v203_v35 = vld [vmem:[%s334_s4] ss:$0 sm:$0xff] }
   0x8   :  { %v100_v46 = vperm.slane %v32_v22, 2  ;;  %s265_s11 = smov 128   ;;  %s266_s12 = smov 8  }
   0x9   :  { %s267_s13 = smov [#allocation4]   ;;  %s167_s5 = sshll.u32 %s336_s6, 4  ;;  %s168_s5 = int_to_ptr.hbm [resolvable:$true] %s167_s5 }
   0xa   :  { %41 = vperm.xlu0 %192, %v25_v7   ;;  %s165_s14 = sshll.u32 %s267_s13, 4  ;;  %s166_s14 = int_to_ptr.vmem [resolvable:$true] %s165_s14 }
   0xb   :  { %v205_v8 = vpop.eup %204 }
   0xc   :  { %55 = vperm.xlu1 %194, %v205_v8   ;;  %71 = vperm.xlu2 %193, %v25_v7   ;;  %v207_v9 = vpop.eup %206 }
  0x12   :  { %195 = vset.pattern.permute.xlu0 %v261_v4 }
  0x13   :  { %80 = vperm.xlu0 %195, %v205_v8  }
  0x14   :  { %60 = vperm.xlu1 %194, %v207_v9   ;;  %197 = vset.pattern.permute.xlu2 %v262_v10 }
  0x15   :  { %93 = vperm.xlu2 %197, %v24_v0  }
  0x1b   :  { %199 = vset.pattern.permute.xlu0 %v262_v10 }
  0x1c   :  { %196 = vset.pattern.permute.xlu1 %v261_v4  ;;  %110 = vperm.xlu0 %199, %v207_v9  }
  0x1d   :  { %84 = vperm.xlu1 %196, %v207_v9   ;;  %106 = vperm.xlu2 %197, %v205_v8  }
  0x24   :  { %202 = vset.pattern.permute.xlu0 %v263_v11 }
  0x25   :  { %198 = vset.pattern.permute.xlu1 %v262_v10  ;;  %201 = vset.pattern.permute.xlu2 %v263_v11 }
  0x26   :  { %97 = vperm.xlu1 %198, %v25_v7   ;;  %123 = vperm.xlu2 %201, %v25_v7  }
  0x2e   :  { %200 = vset.pattern.permute.xlu1 %v263_v11  ;;  %136 = vperm.xlu2 %201, %v207_v9  }
  0x2f   :  { %119 = vperm.xlu1 %200, %v24_v0  }
  0x37   :  { %132 = vperm.xlu1 %200, %v205_v8  }
  0x5e   :  { %v68_v12 = vpop.permute.xlu2 %67 }
  0x5f   :  { %v75_v51 = vmul.f32 %v74_v34, %v68_v12 }
  0x66   :  { %v72_v13 = vpop.permute.xlu2 %71 }
  0x67   :  { %v76_v41 = vmul.f32 %v74_v34, %v72_v13 }
  0x6f   :  { %v94_v14 = vpop.permute.xlu2 %93 }
  0x70   :  { %v101_v56 = vmul.f32 %v100_v46, %v94_v14 }
  0x74   :  { %v37_v15 = vpop.permute.xlu0 %36 }
  0x75   :  { %v45_v44 = vmul.f32 %v44_v24, %v37_v15 }
  0x77   :  { %v107_v16 = vpop.permute.xlu2 %106  ;;  %v51_v52 = vadd.f32 %v203_v35, %v45_v44 }
  0x78   :  { %v114_v63 = vmul.f32 %v113_v28, %v107_v16 }
  0x79   :  { %v77_v55 = vadd.f32 %v75_v51, %v51_v52 }
  0x7b   :  { %v103_v58 = vadd.f32 %v101_v56, %v77_v55 }
  0x7c   :  { %v42_v18 = vpop.permute.xlu0 %41 }
  0x7d   :  { %v46_v36 = vmul.f32 %v44_v24, %v42_v18 }
  0x7e   :  { %v56_v17 = vpop.permute.xlu1 %55 }
  0x7f   :  { %v52_v42 = vadd.f32 %v203_v35, %v46_v36  ;;  %v64_v61 = vmul.f32 %v63_v25, %v56_v17 }
  0x80   :  { %v124_v19 = vpop.permute.xlu2 %123 }
  0x81   :  { %v128_v48 = vmul.f32 %v126_v43, %v124_v19  ;;  %v78_v49 = vadd.f32 %v76_v41, %v52_v42 }
  0x85   :  { %v81_v21 = vpop.permute.xlu0 %80 }
  0x86   :  { %v61_v20 = vpop.permute.xlu1 %60  ;;  %v88_v59 = vmul.f32 %v87_v26, %v81_v21 }
  0x87   :  { %v65_v31 = vmul.f32 %v63_v25, %v61_v20 }
  0x88   :  { %v137_v30 = vpop.permute.xlu2 %136  ;;  %v90_v0 = vadd.f32 %v88_v59, %v64_v61 }
  0x89   :  { %v141_v39 = vmul.f32 %v139_v27, %v137_v30 }
  0x8a   :  { %v116_v2 = vadd.f32 %v114_v63, %v90_v0 }
  0x8e   :  { %v111_v33 = vpop.permute.xlu0 %110 }
  0x8f   :  { %v85_v29 = vpop.permute.xlu1 %84  ;;  %v115_v37 = vmul.f32 %v113_v28, %v111_v33 }
  0x90   :  { %v89_v32 = vmul.f32 %v87_v26, %v85_v29 }
  0x92   :  { %v91_v38 = vadd.f32 %v89_v32, %v65_v31 }
  0x94   :  { %v117_v40 = vadd.f32 %v115_v37, %v91_v38 }
  0x96   :  { %v143_v45 = vadd.f32 %v141_v39, %v117_v40 }
  0x98   :  { %147 = vst [vmem:[#allocation4 + $0x8] sm:$0xff] %v143_v45  ;;  %v98_v47 = vpop.permute.xlu1 %97 }
  0x99   :  { %v102_v50 = vmul.f32 %v100_v46, %v98_v47 }
  0x9b   :  { %v104_v53 = vadd.f32 %v102_v50, %v78_v49 }
  0x9d   :  { %v130_v54 = vadd.f32 %v128_v48, %v104_v53 }
  0x9f   :  { %145 = vst [vmem:[#allocation2 + $0x8] sm:$0xff] %v130_v54 }
  0xa1   :  { %v120_v57 = vpop.permute.xlu1 %119 }
  0xa2   :  { %v127_v60 = vmul.f32 %v126_v43, %v120_v57 }
  0xa4   :  { %v129_v62 = vadd.f32 %v127_v60, %v103_v58 }
  0xa6   :  { %144 = vst [vmem:[#allocation2] sm:$0xff] %v129_v62 }
  0xa7   :  { %160 = dma.vmem_to_hbm [thread:$0]  %s153_s3, 256, %s155_s10, [#allocation3], %s265_s11, %s265_s11, %s266_s12  }
  0xa9   :  { %v133_v1 = vpop.permute.xlu1 %132 }
  0xaa   :  { %v140_v3 = vmul.f32 %v139_v27, %v133_v1 }
  0xac   :  { %v142_v4 = vadd.f32 %v140_v3, %v116_v2 }
  0xae   :  { %146 = vst [vmem:[#allocation4] sm:$0xff] %v142_v4 }
  0xaf   :  { %173 = dma.vmem_to_hbm [thread:$0]  %s166_s14, 256, %s168_s5, [#allocation5], %s265_s11, %s265_s11, %s266_s12  }
  0xb0   :  { %256 = dma.done.wait [#allocation3], 256  }
  0xb1   :  { %257 = vsyncadd [#allocation3], 4294967040 }
  0xb2   :  { %258 = dma.done.wait [#allocation5], 256  }
  0xb3   :  { %259 = vsyncadd [#allocation5], 4294967040 }
  0xb4   :  { %182 = vsyncpa [#allocation3], 1 }
  0xb5   :  { %183 = vsyncpa [#allocation5], 1 }

</bundles_post_ra>
